<compile_context>
chip_gen: v7x
topology: tpu7x:2x2x1
jax: 0.10.0
libtpu: 0.0.40
codegen_flags: <defaults>
</compile_context>

<pallas_src>
import functools
import math

import jax
import jax.numpy as jnp
from jax import lax
from jax.experimental import pallas as pl
from jax.experimental.pallas import tpu as pltpu


# ----------------------------- Pallas kernel ------------------------------ #
def _merge_reduce_norm_kernel(xa_ref, xb_ref, wa_ref, wb_ref, g_ref, b_ref,
                              o_ref, *, eps):
    # xa_ref/xb_ref: (bh, W2, 2C)  ph=0 / ph=1 planes, channels = [pw=0 | pw=1]
    # wa_ref/wb_ref: (2C, 2Co)     row-split reduction weight
    # g_ref/b_ref:   (1, 2Co)      LayerNorm affine
    # o_ref:         (bh, W2, 2Co)
    bh, w2, c2in = xa_ref.shape
    c2out = o_ref.shape[-1]

    # Flatten tokens (leading-dim merge only; lane dim untouched).
    xa = xa_ref[...].reshape(bh * w2, c2in)
    xb = xb_ref[...].reshape(bh * w2, c2in)

    # Linear reduction on the MXU, native-dtype operands, f32 accumulation.
    y = jnp.dot(xa, wa_ref[...], preferred_element_type=jnp.float32)
    y = y + jnp.dot(xb, wb_ref[...], preferred_element_type=jnp.float32)

    # LayerNorm over 2Co (biased variance, PyTorch default), single lane pass.
    inv_n = 1.0 / c2out
    mean = jnp.sum(y, axis=-1, keepdims=True) * inv_n
    ex2 = jnp.sum(y * y, axis=-1, keepdims=True) * inv_n
    inv = lax.rsqrt(ex2 - mean * mean + eps)
    out = (y - mean) * inv
    out = out * g_ref[...].astype(jnp.float32) + b_ref[...].astype(jnp.float32)

    o_ref[...] = out.reshape(bh, w2, c2out).astype(o_ref.dtype)


# ------------------------------ tile picking ------------------------------ #
def _pick_bh(nh, w2, c2in, c2out, itemsize, *, max_tokens=1024,
             act_budget_bytes=8 * 1024 * 1024):
    """Largest divisor of nh such that the (double-buffered) activation blocks
    stay inside a conservative VMEM budget (safe on v5e/v6e/v7x defaults) and
    the token tile is at most `max_tokens`.  No padding copy is ever needed."""
    best = 1
    for d in range(1, nh + 1):
        if nh % d:
            continue
        tok = d * w2
        if tok > max_tokens:
            continue
        # 2 inputs x 2 buffers x (tok, 2C)  +  2 buffers x (tok, 2Co)
        act_bytes = tok * itemsize * (2 * 2 * c2in + 2 * c2out)
        if act_bytes > act_budget_bytes:
            continue
        best = d
    return best


# ------------------------------ wrapper ------------------------------------ #
@functools.partial(jax.jit, static_argnames=("eps",))
def patch_merging_v2(x, w_reduction, gamma, beta, *, eps=1e-5):
    """
    x:            [..., H, W, C]
    w_reduction:  [2C, 4C]  (PyTorch nn.Linear weight layout, out x in, no bias)
    gamma, beta:  [2C]      (LayerNorm affine params)
    returns       [..., ceil(H/2), ceil(W/2), 2C]
    """
    *lead, H, W, C = x.shape
    B = math.prod(lead) if lead else 1
    x = x.reshape(B, H, W, C)

    # Even-pad H/W (matches F.pad in the PyTorch module); only copies when odd.
    if (H % 2) or (W % 2):
        x = jnp.pad(x, ((0, 0), (0, H % 2), (0, W % 2), (0, 0)))
    Hp, Wp = x.shape[1], x.shape[2]
    H2, W2 = Hp // 2, Wp // 2

    c2in = 2 * C
    c2out = w_reduction.shape[0]
    nh = B * H2

    # Free reshape: [B, Hp, Wp, C] -> [B*H2, 2, W2, 2C].
    # ph=0 rows hold [x0 | x2], ph=1 rows hold [x1 | x3]
    # (PyTorch naming: x0=x[0::2,0::2], x1=x[1::2,0::2],
    #                  x2=x[0::2,1::2], x3=x[1::2,1::2]).
    x_r = x.reshape(nh, 2, W2, c2in)

    # Split the reduction weight to match the fused channel order.
    wt = jnp.transpose(w_reduction)                                 # [4C, 2Co]
    wa = jnp.concatenate([wt[0:C], wt[2 * C:3 * C]], axis=0)        # [x0 | x2]
    wb = jnp.concatenate([wt[C:2 * C], wt[3 * C:4 * C]], axis=0)    # [x1 | x3]

    g2 = gamma.reshape(1, c2out)
    b2 = beta.reshape(1, c2out)

    bh = _pick_bh(nh, W2, c2in, c2out, x.dtype.itemsize)
    grid = (nh // bh,)

    out = pl.pallas_call(
        functools.partial(_merge_reduce_norm_kernel, eps=eps),
        out_shape=jax.ShapeDtypeStruct((nh, W2, c2out), x.dtype),
        grid_spec=pltpu.PrefetchScalarGridSpec(
            num_scalar_prefetch=0,
            grid=grid,
            in_specs=[
                # same array passed twice; the squeezed middle dim selects ph
                pl.BlockSpec((bh, None, W2, c2in), lambda i: (i, 0, 0, 0)),
                pl.BlockSpec((bh, None, W2, c2in), lambda i: (i, 1, 0, 0)),
                pl.BlockSpec((c2in, c2out), lambda i: (0, 0)),
                pl.BlockSpec((c2in, c2out), lambda i: (0, 0)),
                pl.BlockSpec((1, c2out), lambda i: (0, 0)),
                pl.BlockSpec((1, c2out), lambda i: (0, 0)),
            ],
            out_specs=pl.BlockSpec((bh, W2, c2out), lambda i: (i, 0, 0)),
        ),
        compiler_params=pltpu.CompilerParams(
            dimension_semantics=("parallel",),
        ),
    )(x_r, x_r, wa, wb, g2, b2)

    return out.reshape(*lead, H2, W2, c2out)


# ------------------------------ reference --------------------------------- #
def _patch_merging_pad_ref(x):
    H, W = x.shape[-3], x.shape[-2]
    pad_cfg = [(0, 0)] * (x.ndim - 3) + [(0, H % 2), (0, W % 2), (0, 0)]
    x = jnp.pad(x, pad_cfg)
    x0 = x[..., 0::2, 0::2, :]
    x1 = x[..., 1::2, 0::2, :]
    x2 = x[..., 0::2, 1::2, :]
    x3 = x[..., 1::2, 1::2, :]
    return jnp.concatenate([x0, x1, x2, x3], axis=-1)


def _reference(x, w_reduction, gamma, beta, eps=1e-5):
    x4 = _patch_merging_pad_ref(x).astype(jnp.float32)
    y = jnp.einsum("...i,oi->...o", x4, w_reduction.astype(jnp.float32))
    mean = jnp.mean(y, axis=-1, keepdims=True)
    var = jnp.mean((y - mean) ** 2, axis=-1, keepdims=True)
    y_hat = (y - mean) * lax.rsqrt(var + eps)
    return y_hat * gamma.astype(jnp.float32) + beta.astype(jnp.float32)


# --------------------------------- main ------------------------------------ #
if __name__ == "__main__":
    key = jax.random.PRNGKey(0)
    k_x, k_w, k_g, k_b = jax.random.split(key, 4)

    # Small shapes: batch=2, H=W=16, dim (C) = 32  ->  output [2, 8, 8, 64]
    B, H, W, C = 2, 16, 16, 32
    x = jax.random.normal(k_x, (B, H, W, C), dtype=jnp.float32)

    # Deterministic params (nn.Linear(4C -> 2C, bias=False) + LayerNorm(2C)).
    bound = 1.0 / (4 * C) ** 0.5
    w_reduction = jax.random.uniform(
        k_w, (2 * C, 4 * C), dtype=jnp.float32, minval=-bound, maxval=bound
    )
    gamma = 1.0 + 0.01 * jax.random.normal(k_g, (2 * C,), dtype=jnp.float32)
    beta = 0.01 * jax.random.normal(k_b, (2 * C,), dtype=jnp.float32)

    out = jax.block_until_ready(patch_merging_v2(x, w_reduction, gamma, beta))

    ref = _reference(x, w_reduction, gamma, beta)
    assert out.shape == (B, H // 2, W // 2, 2 * C), out.shape
    assert jnp.allclose(out, ref, atol=1e-4, rtol=1e-4), float(
        jnp.max(jnp.abs(out - ref))
    )

    print("KERNEL_OK")
</pallas_src>

<mosaic_0001>
module attributes {stable_mosaic.version = 11 : i64} {
  func.func @_merge_reduce_norm_kernel(%arg0: i32, %arg1: memref<16x1x8x64xf32, #tpu.memory_space<vmem>>, %arg2: memref<16x1x8x64xf32, #tpu.memory_space<vmem>>, %arg3: memref<64x64xf32, #tpu.memory_space<vmem>>, %arg4: memref<64x64xf32, #tpu.memory_space<vmem>>, %arg5: memref<1x64xf32, #tpu.memory_space<vmem>>, %arg6: memref<1x64xf32, #tpu.memory_space<vmem>>, %arg7: memref<16x8x64xf32, #tpu.memory_space<vmem>>) attributes {dimension_semantics = [#tpu.dimension_semantics<parallel>], iteration_bounds = array<i64: 1>, scalar_prefetch = 0 : i64, scratch_operands = 0 : i64, tpu.core_type = #tpu.core_type<tc>, window_params = [{transform_indices = @transform_0, window_bounds = array<i64: 16, 1, 8, 64>}, {transform_indices = @transform_1, window_bounds = array<i64: 16, 1, 8, 64>}, {pipeline_mode = #tpu.pipeline_mode<synchronous>, transform_indices = @transform_2, window_bounds = array<i64: 64, 64>}, {pipeline_mode = #tpu.pipeline_mode<synchronous>, transform_indices = @transform_3, window_bounds = array<i64: 64, 64>}, {pipeline_mode = #tpu.pipeline_mode<synchronous>, transform_indices = @transform_4, window_bounds = array<i64: 1, 64>}, {pipeline_mode = #tpu.pipeline_mode<synchronous>, transform_indices = @transform_5, window_bounds = array<i64: 1, 64>}, {transform_indices = @transform_6, window_bounds = array<i64: 16, 8, 64>}]} {
    %c0 = arith.constant 0 : index
    %c0_0 = arith.constant 0 : index
    %c0_1 = arith.constant 0 : index
    %c0_2 = arith.constant 0 : index
    %0 = vector.load %arg1[%c0, %c0_0, %c0_1, %c0_2] : memref<16x1x8x64xf32, #tpu.memory_space<vmem>>, vector<16x1x8x64xf32>
    %1 = vector.shape_cast %0 : vector<16x1x8x64xf32> to vector<16x8x64xf32>
    %2 = vector.shape_cast %1 : vector<16x8x64xf32> to vector<128x64xf32>
    %c0_3 = arith.constant 0 : index
    %c0_4 = arith.constant 0 : index
    %c0_5 = arith.constant 0 : index
    %c0_6 = arith.constant 0 : index
    %3 = vector.load %arg2[%c0_3, %c0_4, %c0_5, %c0_6] : memref<16x1x8x64xf32, #tpu.memory_space<vmem>>, vector<16x1x8x64xf32>
    %4 = vector.shape_cast %3 : vector<16x1x8x64xf32> to vector<16x8x64xf32>
    %5 = vector.shape_cast %4 : vector<16x8x64xf32> to vector<128x64xf32>
    %c0_7 = arith.constant 0 : index
    %c0_8 = arith.constant 0 : index
    %6 = vector.load %arg3[%c0_7, %c0_8] : memref<64x64xf32, #tpu.memory_space<vmem>>, vector<64x64xf32>
    %cst = arith.constant dense<0.000000e+00> : vector<128x64xf32>
    %7 = tpu.matmul %2, %6, %cst {dimension_numbers = #tpu.dot_dimension_numbers<[1], [0], [0], [1], [0, 0, 1, 1], [], []>} : vector<128x64xf32>, vector<64x64xf32>, vector<128x64xf32> -> vector<128x64xf32>
    %c0_9 = arith.constant 0 : index
    %c0_10 = arith.constant 0 : index
    %8 = vector.load %arg4[%c0_9, %c0_10] : memref<64x64xf32, #tpu.memory_space<vmem>>, vector<64x64xf32>
    %cst_11 = arith.constant dense<0.000000e+00> : vector<128x64xf32>
    %9 = tpu.matmul %5, %8, %cst_11 {dimension_numbers = #tpu.dot_dimension_numbers<[1], [0], [0], [1], [0, 0, 1, 1], [], []>} : vector<128x64xf32>, vector<64x64xf32>, vector<128x64xf32> -> vector<128x64xf32>
    %10 = arith.addf %7, %9 : vector<128x64xf32>
    %cst_12 = arith.constant dense<0.000000e+00> : vector<128xf32>
    %11 = vector.multi_reduction <add>, %10, %cst_12 [1] : vector<128x64xf32> to vector<128xf32>
    %12 = vector.shape_cast %11 : vector<128xf32> to vector<128x1xf32>
    %cst_13 = arith.constant 1.562500e-02 : f32
    %13 = vector.broadcast %cst_13 : f32 to vector<128x1xf32>
    %14 = arith.mulf %12, %13 : vector<128x1xf32>
    %15 = arith.mulf %10, %10 : vector<128x64xf32>
    %cst_14 = arith.constant dense<0.000000e+00> : vector<128xf32>
    %16 = vector.multi_reduction <add>, %15, %cst_14 [1] : vector<128x64xf32> to vector<128xf32>
    %17 = vector.shape_cast %16 : vector<128xf32> to vector<128x1xf32>
    %cst_15 = arith.constant 1.562500e-02 : f32
    %18 = vector.broadcast %cst_15 : f32 to vector<128x1xf32>
    %19 = arith.mulf %17, %18 : vector<128x1xf32>
    %20 = arith.mulf %14, %14 : vector<128x1xf32>
    %21 = arith.subf %19, %20 : vector<128x1xf32>
    %cst_16 = arith.constant 9.99999974E-6 : f32
    %22 = vector.broadcast %cst_16 : f32 to vector<128x1xf32>
    %23 = arith.addf %21, %22 : vector<128x1xf32>
    %24 = math.rsqrt %23 : vector<128x1xf32>
    %25 = vector.broadcast %14 : vector<128x1xf32> to vector<128x64xf32>
    %26 = arith.subf %10, %25 : vector<128x64xf32>
    %27 = vector.broadcast %24 : vector<128x1xf32> to vector<128x64xf32>
    %28 = arith.mulf %26, %27 : vector<128x64xf32>
    %c0_17 = arith.constant 0 : index
    %c0_18 = arith.constant 0 : index
    %29 = vector.load %arg5[%c0_17, %c0_18] : memref<1x64xf32, #tpu.memory_space<vmem>>, vector<1x64xf32>
    %30 = vector.broadcast %29 : vector<1x64xf32> to vector<128x64xf32>
    %31 = arith.mulf %28, %30 : vector<128x64xf32>
    %c0_19 = arith.constant 0 : index
    %c0_20 = arith.constant 0 : index
    %32 = vector.load %arg6[%c0_19, %c0_20] : memref<1x64xf32, #tpu.memory_space<vmem>>, vector<1x64xf32>
    %33 = vector.broadcast %32 : vector<1x64xf32> to vector<128x64xf32>
    %34 = arith.addf %31, %33 : vector<128x64xf32>
    %35 = vector.shape_cast %34 : vector<128x64xf32> to vector<16x8x64xf32>
    %c0_21 = arith.constant 0 : index
    %c0_22 = arith.constant 0 : index
    %c0_23 = arith.constant 0 : index
    %36 = vector.load %arg7[%c0_21, %c0_22, %c0_23] : memref<16x8x64xf32, #tpu.memory_space<vmem>>, vector<16x8x64xf32>
    tpu.vector_store %arg7[%c0_21, %c0_22, %c0_23], %35 {strides = array<i32>} : memref<16x8x64xf32, #tpu.memory_space<vmem>>, vector<16x8x64xf32>,
    return
  }
  func.func @transform_0(%arg0: i32) -> (i32, i32, i32, i32) {
    %c0_i32 = arith.constant 0 : i32
    %c0_i32_0 = arith.constant 0 : i32
    %c0_i32_1 = arith.constant 0 : i32
    %c0_i32_2 = arith.constant 0 : i32
    return %arg0, %c0_i32, %c0_i32_0, %c0_i32_1 : i32, i32, i32, i32
  }
  func.func @transform_1(%arg0: i32) -> (i32, i32, i32, i32) {
    %c1_i32 = arith.constant 1 : i32
    %c0_i32 = arith.constant 0 : i32
    %c0_i32_0 = arith.constant 0 : i32
    %c0_i32_1 = arith.constant 0 : i32
    return %arg0, %c1_i32, %c0_i32, %c0_i32_0 : i32, i32, i32, i32
  }
  func.func @transform_2(%arg0: i32) -> (i32, i32) {
    %c0_i32 = arith.constant 0 : i32
    %c0_i32_0 = arith.constant 0 : i32
    %c0_i32_1 = arith.constant 0 : i32
    return %c0_i32, %c0_i32_0 : i32, i32
  }
  func.func @transform_3(%arg0: i32) -> (i32, i32) {
    %c0_i32 = arith.constant 0 : i32
    %c0_i32_0 = arith.constant 0 : i32
    %c0_i32_1 = arith.constant 0 : i32
    return %c0_i32, %c0_i32_0 : i32, i32
  }
  func.func @transform_4(%arg0: i32) -> (i32, i32) {
    %c0_i32 = arith.constant 0 : i32
    %c0_i32_0 = arith.constant 0 : i32
    %c0_i32_1 = arith.constant 0 : i32
    return %c0_i32, %c0_i32_0 : i32, i32
  }
  func.func @transform_5(%arg0: i32) -> (i32, i32) {
    %c0_i32 = arith.constant 0 : i32
    %c0_i32_0 = arith.constant 0 : i32
    %c0_i32_1 = arith.constant 0 : i32
    return %c0_i32, %c0_i32_0 : i32, i32
  }
  func.func @transform_6(%arg0: i32) -> (i32, i32, i32) {
    %c0_i32 = arith.constant 0 : i32
    %c0_i32_0 = arith.constant 0 : i32
    %c0_i32_1 = arith.constant 0 : i32
    return %arg0, %c0_i32, %c0_i32_0 : i32, i32, i32
  }
}

</mosaic_0001>

<bundles_post_ra>
// kernel: patch_merging_v2.1
= control target key start
LH: loop header
LB: loop body
LE: loop exit
PB: predicated region body
PF: predicated region fallthrough
CT: control target
= control target key end

     0   :  { %vm261_vm0 = vcmask 523264   ;;  %s1721_s0 = inlined_call_operand.vmem [shape: f32[16,2,8,64], index: 0, kind: input, shape index: {}, may-alias: {0,1}]   ;;  %s1722_s1 = inlined_call_operand.vmem [shape: f32[16,2,8,64], index: 1, kind: input, shape index: {}, may-alias: {0,1}]   ;;  %s1723_s2 = inlined_call_operand.vmem [shape: f32[64,64], index: 2, kind: input, shape index: {}]   ;;  %s1724_s3 = inlined_call_operand.vmem [shape: f32[64,64], index: 3, kind: input, shape index: {}]   ;;  %s1725_s4 = inlined_call_operand.vmem [shape: f32[1,64], index: 4, kind: input, shape index: {}]   ;;  %s1726_s5 = inlined_call_operand.vmem [shape: f32[1,64], index: 5, kind: input, shape index: {}]   ;;  %s1727_s6 = inlined_call_operand.hbm [shape: f32[16,8,64], index: 6, kind: output, shape index: {}]  }
   0x1   :  { %v253_v0 = vld [vmem:[%s1724_s3] sm:$0xff]  ;;  %v254_v1 = vld [vmem:[%s1724_s3 + $0x8] sm:$0xff]  ;;  %v255_v5 = vld [vmem:[%s1724_s3 + $0x10] sm:$0xff] }
   0x2   :  { %v245_v2 = vld [vmem:[%s1723_s2] sm:$0xff]  ;;  %v1152_v3 = vpack.c.bf16 %v254_v1, %v253_v0  ;;  %v246_v4 = vld [vmem:[%s1723_s2 + $0x8] sm:$0xff]  ;;  %v256_v6 = vld [vmem:[%s1724_s3 + $0x18] sm:$0xff] }
   0x3   :  { %v1168_v7 = vpack.c.bf16 %v246_v4, %v245_v2  ;;  %v1156_v8 = vpack.c.bf16 %v256_v6, %v255_v5  ;;  %v247_v9 = vld [vmem:[%s1723_s2 + $0x10] sm:$0xff]  ;;  %v248_v10 = vld [vmem:[%s1723_s2 + $0x18] sm:$0xff]  ;;  %v257_v11 = vld [vmem:[%s1724_s3 + $0x20] sm:$0xff] }
   0x4   :  { %1153 = vmatprep.subr.bf16.mxu1 %v1152_v3  ;;  %v1172_v12 = vpack.c.bf16 %v248_v10, %v247_v9  ;;  %v258_v13 = vld [vmem:[%s1724_s3 + $0x28] sm:$0xff]  ;;  %v249_v14 = vld [vmem:[%s1723_s2 + $0x20] sm:$0xff]  ;;  %v259_v20 = vld [vmem:[%s1724_s3 + $0x30] sm:$0xff] }
   0x5   :  { %v250_v15 = vld [vmem:[%s1723_s2 + $0x28] sm:$0xff]  ;;  %1169 = vmatprep.subr.bf16.mxu0 %v1168_v7  ;;  %1155 = vmatpush3.bf16.msra.mxu1 %v1152_v3  ;;  %v1160_v16 = vpack.c.bf16 %v258_v13, %v257_v11  ;;  %v71_v18 = vld [vmem:[%s1721_s0] sm:$0xff]  ;;  %v260_v21 = vld [vmem:[%s1724_s3 + $0x38] sm:$0xff] }
   0x6   :  { %1171 = vmatpush3.bf16.msra.mxu0 %v1168_v7  ;;  %1157 = vmatprep.subr.bf16.mxu1 %v1156_v8  ;;  %v974_v17 = vld [vmem:[%s1722_s1 + $0x8] sm:$0xff]  ;;  %v1176_v19 = vpack.c.bf16 %v250_v15, %v249_v14  ;;  %v251_v22 = vld [vmem:[%s1723_s2 + $0x30] sm:$0xff]  ;;  %v252_v23 = vld [vmem:[%s1723_s2 + $0x38] sm:$0xff]  ;;  %v1164_v24 = vpack.c.bf16 %v260_v21, %v259_v20 }
   0x7   :  { %1173 = vmatprep.subr.bf16.mxu0 %v1172_v12  ;;  %1088 = vmatprep.mubr.msk.f32.mxu1 %vm261_vm0, %v974_v17  ;;  %v1180_v25 = vpack.c.bf16 %v252_v23, %v251_v22  ;;  %v975_v26 = vld [vmem:[%s1722_s1 + $0x18] sm:$0xff] }
   0x8   :  { %1128 = vmatprep.mubr.msk.f32.mxu0 %vm261_vm0, %v71_v18 }
   0x9   :  { %1159 = vmatpush3.bf16.msra.mxu1 %v1156_v8 }
   0xa   :  { %1175 = vmatpush3.bf16.msra.mxu0 %v1172_v12  ;;  %1161 = vmatprep.subr.bf16.mxu1 %v1160_v16 }
   0xb   :  { %1177 = vmatprep.subr.bf16.mxu0 %v1176_v19 }
   0xd   :  { %1163 = vmatpush3.bf16.msra.mxu1 %v1160_v16 }
   0xe   :  { %1179 = vmatpush3.bf16.msra.mxu0 %v1176_v19  ;;  %1165 = vmatprep.subr.bf16.mxu1 %v1164_v24 }
   0xf   :  { %1181 = vmatprep.subr.bf16.mxu0 %v1180_v25 }
  0x11   :  { %1167 = vmatpush3.bf16.msra.mxu1 %v1164_v24 }
  0x12   :  { %11 = vsyncpa [#allocation5], 0  ;;  %1183 = vmatpush3.bf16.msra.mxu0 %v1180_v25  ;;  %v73_v27 = vld [vmem:[%s1721_s0 + $0x10] sm:$0xff]  ;;  %v976_v28 = vld [vmem:[%s1722_s1 + $0x28] sm:$0xff] }
  0x13   :  { %v75_v29 = vld [vmem:[%s1721_s0 + $0x20] sm:$0xff]  ;;  %v977_v30 = vld [vmem:[%s1722_s1 + $0x38] sm:$0xff]  ;;  %v77_v31 = vld [vmem:[%s1721_s0 + $0x30] sm:$0xff] }
  0x14   :  { %1089 = vmatmul.mubr.msk.f32.vlgmr.msra.gmra.mrb[0].mxu1 %vm261_vm0, %v975_v26  ;;  %v978_v32 = vld [vmem:[%s1722_s1 + $0x48] sm:$0xff]  ;;  %v79_v33 = vld [vmem:[%s1721_s0 + $0x40] sm:$0xff]  ;;  %v979_v34 = vld [vmem:[%s1722_s1 + $0x58] sm:$0xff] }
  0x15   :  { %1129 = vmatmul.mubr.msk.f32.vlgmr.msra.gmra.mrb[0].mxu0 %vm261_vm0, %v73_v27  ;;  %1091 = vmatprep.mubr.msk.f32.mxu1 %vm261_vm0, %v976_v28  ;;  %v81_v35 = vld [vmem:[%s1721_s0 + $0x50] sm:$0xff]  ;;  %v980_v36 = vld [vmem:[%s1722_s1 + $0x68] sm:$0xff]  ;;  %v83_v37 = vld [vmem:[%s1721_s0 + $0x60] sm:$0xff] }
  0x16   :  { %1131 = vmatprep.mubr.msk.f32.mxu0 %vm261_vm0, %v75_v29  ;;  %v981_v38 = vld [vmem:[%s1722_s1 + $0x78] sm:$0xff]  ;;  %v85_v39 = vld [vmem:[%s1721_s0 + $0x70] sm:$0xff]  ;;  %v982_v40 = vld [vmem:[%s1722_s1 + $0x88] sm:$0xff] }
  0x17   :  { %v87_v41 = vld [vmem:[%s1721_s0 + $0x80] sm:$0xff]  ;;  %v983_v42 = vld [vmem:[%s1722_s1 + $0x98] sm:$0xff]  ;;  %v89_v43 = vld [vmem:[%s1721_s0 + $0x90] sm:$0xff] }
  0x18   :  { %1092 = vmatmul.mubr.msk.f32.gmra.mrb[2].mxu1 %vm261_vm0, %v977_v30  ;;  %v984_v44 = vld [vmem:[%s1722_s1 + $0xa8] sm:$0xff]  ;;  %v91_v45 = vld [vmem:[%s1721_s0 + $0xa0] sm:$0xff]  ;;  %v985_v46 = vld [vmem:[%s1722_s1 + $0xb8] sm:$0xff] }
  0x19   :  { %1132 = vmatmul.mubr.msk.f32.gmra.mrb[2].mxu0 %vm261_vm0, %v77_v31  ;;  %1094 = vmatprep.mubr.msk.f32.mxu1 %vm261_vm0, %v978_v32  ;;  %v93_v47 = vld [vmem:[%s1721_s0 + $0xb0] sm:$0xff]  ;;  %v986_v48 = vld [vmem:[%s1722_s1 + $0xc8] sm:$0xff]  ;;  %v95_v49 = vld [vmem:[%s1721_s0 + $0xc0] sm:$0xff] }
  0x1a   :  { %1134 = vmatprep.mubr.msk.f32.mxu0 %vm261_vm0, %v79_v33  ;;  %v987_v50 = vld [vmem:[%s1722_s1 + $0xd8] sm:$0xff]  ;;  %v97_v51 = vld [vmem:[%s1721_s0 + $0xd0] sm:$0xff]  ;;  %v988_v52 = vld [vmem:[%s1722_s1 + $0xe8] sm:$0xff] }
  0x1b   :  { %v99_v53 = vld [vmem:[%s1721_s0 + $0xe0] sm:$0xff]  ;;  %v989_v54 = vld [vmem:[%s1722_s1 + $0xf8] sm:$0xff]  ;;  %v101_v55 = vld [vmem:[%s1721_s0 + $0xf0] sm:$0xff] }
  0x1c   :  { %1095 = vmatmul.mubr.msk.f32.gmra.mrb[4].mxu1 %vm261_vm0, %v979_v34 }
  0x1d   :  { %1135 = vmatmul.mubr.msk.f32.gmra.mrb[4].mxu0 %vm261_vm0, %v81_v35  ;;  %1097 = vmatprep.mubr.msk.f32.mxu1 %vm261_vm0, %v980_v36 }
  0x1e   :  { %1137 = vmatprep.mubr.msk.f32.mxu0 %vm261_vm0, %v83_v37 }
  0x20   :  { %1098 = vmatmul.mubr.msk.f32.gmra.mrb[6].mxu1 %vm261_vm0, %v981_v38 }
  0x21   :  { %1138 = vmatmul.mubr.msk.f32.gmra.mrb[6].mxu0 %vm261_vm0, %v85_v39  ;;  %1100 = vmatprep.mubr.msk.f32.mxu1 %vm261_vm0, %v982_v40 }
  0x22   :  { %1140 = vmatprep.mubr.msk.f32.mxu0 %vm261_vm0, %v87_v41 }
  0x24   :  { %1101 = vmatmul.mubr.msk.f32.gmra.mrb[8].mxu1 %vm261_vm0, %v983_v42 }
  0x25   :  { %1141 = vmatmul.mubr.msk.f32.gmra.mrb[8].mxu0 %vm261_vm0, %v89_v43  ;;  %1103 = vmatprep.mubr.msk.f32.mxu1 %vm261_vm0, %v984_v44 }
  0x26   :  { %1143 = vmatprep.mubr.msk.f32.mxu0 %vm261_vm0, %v91_v45 }
  0x28   :  { %1104 = vmatmul.mubr.msk.f32.gmra.mrb[10].mxu1 %vm261_vm0, %v985_v46 }
  0x29   :  { %1144 = vmatmul.mubr.msk.f32.gmra.mrb[10].mxu0 %vm261_vm0, %v93_v47  ;;  %1106 = vmatprep.mubr.msk.f32.mxu1 %vm261_vm0, %v986_v48 }
  0x2a   :  { %1146 = vmatprep.mubr.msk.f32.mxu0 %vm261_vm0, %v95_v49 }
  0x2c   :  { %1107 = vmatmul.mubr.msk.f32.gmra.mrb[12].mxu1 %vm261_vm0, %v987_v50 }
  0x2d   :  { %1147 = vmatmul.mubr.msk.f32.gmra.mrb[12].mxu0 %vm261_vm0, %v97_v51  ;;  %1109 = vmatprep.mubr.msk.f32.mxu1 %vm261_vm0, %v988_v52 }
  0x2e   :  { %1149 = vmatprep.mubr.msk.f32.mxu0 %vm261_vm0, %v99_v53 }
  0x30   :  { %1110 = vmatmul.mubr.msk.f32.gmra.mrb[14].mxu1 %vm261_vm0, %v989_v54 }
  0x31   :  { %1150 = vmatmul.mubr.msk.f32.gmra.mrb[14].mxu0 %vm261_vm0, %v101_v55 }
  0xe7   :  { %v1090_v56 = vpop.f32.mrb[0].mxu1 }
  0xe8   :  { %v1130_v57 = vpop.f32.mrb[0].mxu0  ;;  %v376_v58 = vpop.f32.mrb[1].mxu1 }
  0xe9   :  { %v1473_v59 = vadd.f32 %v1130_v57, %v1090_v56  ;;  %v569_v60 = vpop.f32.mrb[1].mxu0 }
  0xea   :  { %v1475_v61 = vadd.f32 %v569_v60, %v376_v58 }
  0xeb   :  { %v651_v62 = vsel %vm261_vm0, %v1473_v59, 0.0  ;;  %v1093_v63 = vpop.f32.mrb[2].mxu1  ;;  %v713_v0 = vmul.f32 %v1473_v59, %v1473_v59 }
  0xec   :  { %652 = vadd.xlane.f32.xlu0 %v651_v62  ;;  %v1133_v1 = vpop.f32.mrb[2].mxu0  ;;  %v386_v2 = vpop.f32.mrb[3].mxu1  ;;  %v648_v7 = vsel %vm261_vm0, %v1475_v61, 0.0  ;;  %v712_v9 = vmul.f32 %v1475_v61, %v1475_v61 }
  0xed   :  { %v1481_v3 = vadd.f32 %v1133_v1, %v1093_v63  ;;  %v731_v4 = vsel %vm261_vm0, %v713_v0, 0.0  ;;  %v579_v5 = vpop.f32.mrb[3].mxu0 }
  0xee   :  { %732 = vadd.xlane.f32.xlu1 %v731_v4  ;;  %v1484_v6 = vadd.f32 %v579_v5, %v386_v2  ;;  %v728_v16 = vsel %vm261_vm0, %v712_v9, 0.0 }
  0xef   :  { %v657_v8 = vsel %vm261_vm0, %v1481_v3, 0.0  ;;  %v1096_v10 = vpop.f32.mrb[4].mxu1  ;;  %v715_v22 = vmul.f32 %v1481_v3, %v1481_v3 }
  0xf0   :  { %649 = vadd.xlane.f32.xlu0 %v648_v7  ;;  %v1136_v11 = vpop.f32.mrb[4].mxu0  ;;  %v396_v12 = vpop.f32.mrb[5].mxu1  ;;  %v714_v17 = vmul.f32 %v1484_v6, %v1484_v6  ;;  %v654_v21 = vsel %vm261_vm0, %v1484_v6, 0.0 }
  0xf1   :  { %v1492_v13 = vadd.f32 %v1136_v11, %v1096_v10  ;;  %v589_v14 = vpop.f32.mrb[5].mxu0  ;;  %v737_v30 = vsel %vm261_vm0, %v715_v22, 0.0 }
  0xf2   :  { %658 = vadd.xlane.f32.xlu1 %v657_v8  ;;  %v1494_v15 = vadd.f32 %v589_v14, %v396_v12  ;;  %v734_v26 = vsel %vm261_vm0, %v714_v17, 0.0 }
  0xf3   :  { %v1099_v18 = vpop.f32.mrb[6].mxu1  ;;  %v663_v36 = vsel %vm261_vm0, %v1492_v13, 0.0  ;;  %v717_v41 = vmul.f32 %v1492_v13, %v1492_v13 }
  0xf4   :  { %729 = vadd.xlane.f32.xlu0 %v728_v16  ;;  %v1139_v19 = vpop.f32.mrb[6].mxu0  ;;  %v406_v20 = vpop.f32.mrb[7].mxu1  ;;  %v660_v31 = vsel %vm261_vm0, %v1494_v15, 0.0  ;;  %v716_v32 = vmul.f32 %v1494_v15, %v1494_v15 }
  0xf5   :  { %v1503_v23 = vadd.f32 %v1139_v19, %v1099_v18  ;;  %v599_v24 = vpop.f32.mrb[7].mxu0  ;;  %v743_v48 = vsel %vm261_vm0, %v717_v41, 0.0 }
  0xf6   :  { %655 = vadd.xlane.f32.xlu1 %v654_v21  ;;  %v1505_v25 = vadd.f32 %v599_v24, %v406_v20  ;;  %v740_v40 = vsel %vm261_vm0, %v716_v32, 0.0 }
  0xf7   :  { %v1102_v27 = vpop.f32.mrb[8].mxu1  ;;  %v669_v54 = vsel %vm261_vm0, %v1503_v23, 0.0  ;;  %v719_v60 = vmul.f32 %v1503_v23, %v1503_v23 }
  0xf8   :  { %735 = vadd.xlane.f32.xlu0 %v734_v26  ;;  %v1142_v28 = vpop.f32.mrb[8].mxu0  ;;  %v416_v29 = vpop.f32.mrb[9].mxu1  ;;  %v666_v49 = vsel %vm261_vm0, %v1505_v25, 0.0  ;;  %v718_v50 = vmul.f32 %v1505_v25, %v1505_v25 }
  0xf9   :  { %v1513_v33 = vadd.f32 %v1142_v28, %v1102_v27  ;;  %v609_v34 = vpop.f32.mrb[9].mxu0  ;;  %v749_v1 = vsel %vm261_vm0, %v719_v60, 0.0 }
  0xfa   :  { %738 = vadd.xlane.f32.xlu1 %v737_v30  ;;  %v1515_v35 = vadd.f32 %v609_v34, %v416_v29  ;;  %v746_v58 = vsel %vm261_vm0, %v718_v50, 0.0 }
  0xfb   :  { %v1105_v37 = vpop.f32.mrb[10].mxu1  ;;  %v675_v5 = vsel %vm261_vm0, %v1513_v33, 0.0  ;;  %v721_v8 = vmul.f32 %v1513_v33, %v1513_v33 }
  0xfc   :  { %661 = vadd.xlane.f32.xlu0 %v660_v31  ;;  %v1145_v38 = vpop.f32.mrb[10].mxu0  ;;  %v426_v39 = vpop.f32.mrb[11].mxu1  ;;  %v672_v2 = vsel %vm261_vm0, %v1515_v35, 0.0  ;;  %v720_v4 = vmul.f32 %v1515_v35, %v1515_v35 }
  0xfd   :  { %v1522_v42 = vadd.f32 %v1145_v38, %v1105_v37  ;;  %v619_v43 = vpop.f32.mrb[11].mxu0  ;;  %v755_v9 = vsel %vm261_vm0, %v721_v8, 0.0 }
  0xfe   :  { %664 = vadd.xlane.f32.xlu1 %v663_v36  ;;  %v1524_v44 = vadd.f32 %v619_v43, %v426_v39  ;;  %v752_v7 = vsel %vm261_vm0, %v720_v4, 0.0 }
  0xff   :  { %v1108_v45 = vpop.f32.mrb[12].mxu1  ;;  %v681_v12 = vsel %vm261_vm0, %v1522_v42, 0.0  ;;  %v723_v16 = vmul.f32 %v1522_v42, %v1522_v42 }
 0x100   :  { %741 = vadd.xlane.f32.xlu0 %v740_v40  ;;  %v1148_v46 = vpop.f32.mrb[12].mxu0  ;;  %v436_v47 = vpop.f32.mrb[13].mxu1  ;;  %v678_v10 = vsel %vm261_vm0, %v1524_v44, 0.0  ;;  %v722_v11 = vmul.f32 %v1524_v44, %v1524_v44 }
 0x101   :  { %v1531_v51 = vadd.f32 %v1148_v46, %v1108_v45  ;;  %v629_v52 = vpop.f32.mrb[13].mxu0  ;;  %v761_v17 = vsel %vm261_vm0, %v723_v16, 0.0 }
 0x102   :  { %744 = vadd.xlane.f32.xlu1 %v743_v48  ;;  %v1533_v53 = vadd.f32 %v629_v52, %v436_v47  ;;  %v758_v14 = vsel %vm261_vm0, %v722_v11, 0.0 }
 0x103   :  { %v1111_v55 = vpop.f32.mrb[14].mxu1  ;;  %v687_v20 = vsel %vm261_vm0, %v1531_v51, 0.0  ;;  %v725_v22 = vmul.f32 %v1531_v51, %v1531_v51 }
 0x104   :  { %667 = vadd.xlane.f32.xlu0 %v666_v49  ;;  %v1151_v56 = vpop.f32.mrb[14].mxu0  ;;  %v446_v57 = vpop.f32.mrb[15].mxu1  ;;  %v684_v18 = vsel %vm261_vm0, %v1533_v53, 0.0  ;;  %v724_v19 = vmul.f32 %v1533_v53, %v1533_v53 }
 0x105   :  { %v1540_v62 = vadd.f32 %v1151_v56, %v1111_v55  ;;  %v639_v63 = vpop.f32.mrb[15].mxu0  ;;  %v767_v24 = vsel %vm261_vm0, %v725_v22, 0.0 }
 0x106   :  { %670 = vadd.xlane.f32.xlu1 %v669_v54  ;;  %v1542_v0 = vadd.f32 %v639_v63, %v446_v57  ;;  %v764_v21 = vsel %vm261_vm0, %v724_v19, 0.0 }
 0x107   :  { %v693_v28 = vsel %vm261_vm0, %v1540_v62, 0.0  ;;  %v727_v30 = vmul.f32 %v1540_v62, %v1540_v62 }
 0x108   :  { %747 = vadd.xlane.f32.xlu0 %v746_v58  ;;  %v690_v26 = vsel %vm261_vm0, %v1542_v0, 0.0  ;;  %v726_v27 = vmul.f32 %v1542_v0, %v1542_v0 }
 0x109   :  { %v773_v31 = vsel %vm261_vm0, %v727_v30, 0.0 }
 0x10a   :  { %750 = vadd.xlane.f32.xlu1 %v749_v1  ;;  %v770_v29 = vsel %vm261_vm0, %v726_v27, 0.0 }
 0x10c   :  { %673 = vadd.xlane.f32.xlu0 %v672_v2 }
 0x10e   :  { %676 = vadd.xlane.f32.xlu1 %v675_v5 }
 0x110   :  { %753 = vadd.xlane.f32.xlu0 %v752_v7 }
 0x112   :  { %756 = vadd.xlane.f32.xlu1 %v755_v9 }
 0x114   :  { %679 = vadd.xlane.f32.xlu0 %v678_v10 }
 0x116   :  { %682 = vadd.xlane.f32.xlu1 %v681_v12  ;;  %v1595_v12 = vld [vmem:[%s1725_s4] ss:$0 sm:$0xff]  ;;  %s1259_s4 = smov [#allocation4]  }
 0x118   :  { %759 = vadd.xlane.f32.xlu0 %v758_v14 }
 0x11a   :  { %762 = vadd.xlane.f32.xlu1 %v761_v17 }
 0x11c   :  { %685 = vadd.xlane.f32.xlu0 %v684_v18 }
 0x11e   :  { %688 = vadd.xlane.f32.xlu1 %v687_v20 }
 0x120   :  { %765 = vadd.xlane.f32.xlu0 %v764_v21 }
 0x122   :  { %768 = vadd.xlane.f32.xlu1 %v767_v24 }
 0x124   :  { %691 = vadd.xlane.f32.xlu0 %v690_v26 }
 0x126   :  { %694 = vadd.xlane.f32.xlu1 %v693_v28 }
 0x128   :  { %771 = vadd.xlane.f32.xlu0 %v770_v29 }
 0x12a   :  { %774 = vadd.xlane.f32.xlu1 %v773_v31 }
 0x179   :  { %v653_v32 = vpop.xlane.xlu0 %652 }
 0x17a   :  { %v697_v34 = vmul.f32 0.015625, %v653_v32 }
 0x17b   :  { %v733_v36 = vpop.xlane.xlu1 %732 }
 0x17c   :  { %v793_v37 = vmul.f32 %v697_v34, %v697_v34  ;;  %v777_v38 = vmul.f32 0.015625, %v733_v36  ;;  %v857_v9 = vsub.f32 %v1473_v59, %v697_v34  ;;  %v1604_v59 = vld [vmem:[%s1726_s5] ss:$0 sm:$0xff]  ;;  %s955_s5 = sshll.u32 %s1259_s4, 4  ;;  %s956_s5 = int_to_ptr.vmem [resolvable:$true] %s955_s5 }
 0x17d   :  { %v650_v39 = vpop.xlane.xlu0 %649  ;;  %s1235_s17 = scalar_lea.vmem %s956_s5, 2048  ;;  %p1240_p1 = scmp.lt.s32.totalorder %s956_s5, %s956_s5 }
 0x17e   :  { %v809_v40 = vsub.f32 %v777_v38, %v793_v37  ;;  %v696_v41 = vmul.f32 0.015625, %v650_v39  ;;  %p1236_p0 = scmp.ne.s32.totalorder %s956_s5, %s1235_s17  ;;  %p1241_p2 = scmp.lt.s32.totalorder %s1235_s17, %s1235_s17 }
 0x17f   :  { %v659_v43 = vpop.xlane.xlu1 %658 }
 0x180   :  { %v825_v45 = vadd.f32 1e-05, %v809_v40  ;;  %v792_v47 = vmul.f32 %v696_v41, %v696_v41  ;;  %v1585_v50 = vmul.f32 0.015625, %v659_v43  ;;  %v856_v29 = vsub.f32 %v1475_v61, %v696_v41  ;;  %p1242_p3 = por %p1241_p2, %p1240_p1 }
 0x181   :  { %v730_v46 = vpop.xlane.xlu0 %729 }
 0x182   :  { %1203 = vrsqrt.f32 %v825_v45  ;;  %v776_v48 = vmul.f32 0.015625, %v730_v46  ;;  %v795_v63 = vmul.f32 %v1585_v50, %v1585_v50  ;;  %p1243_p4 = pnand %p1242_p3, %p1236_p0 }
 0x183   :  { %v656_v49 = vpop.xlane.xlu1 %655 }
 0x184   :  { %v808_v52 = vsub.f32 %v776_v48, %v792_v47  ;;  %v698_v54 = vmul.f32 0.015625, %v656_v49  ;;  %v859_v48 = vsub.f32 %v1481_v3, %v1585_v50 }
 0x185   :  { %v736_v55 = vpop.xlane.xlu0 %735 }
 0x186   :  { %v824_v56 = vadd.f32 1e-05, %v808_v52  ;;  %v794_v57 = vmul.f32 %v698_v54, %v698_v54  ;;  %v778_v58 = vmul.f32 0.015625, %v736_v55  ;;  %v858_v45 = vsub.f32 %v1484_v6, %v698_v54 }
 0x187   :  { %v739_v60 = vpop.xlane.xlu1 %738 }
 0x188   :  { %1205 = vrsqrt.f32 %v824_v56  ;;  %v810_v1 = vsub.f32 %v778_v58, %v794_v57  ;;  %v779_v2 = vmul.f32 0.015625, %v739_v60 }
 0x189   :  { %v662_v4 = vpop.xlane.xlu0 %661 }
 0x18a   :  { %v826_v5 = vadd.f32 1e-05, %v810_v1  ;;  %v811_v7 = vsub.f32 %v779_v2, %v795_v63  ;;  %v1589_v8 = vmul.f32 0.015625, %v662_v4 }
 0x18b   :  { %v665_v10 = vpop.xlane.xlu1 %664 }
 0x18c   :  { %v1204_v11 = vpop.eup %1203  ;;  %1207 = vrsqrt.f32 %v826_v5  ;;  %v827_v14 = vadd.f32 1e-05, %v811_v7  ;;  %v796_v16 = vmul.f32 %v1589_v8, %v1589_v8  ;;  %v1599_v18 = vmul.f32 0.015625, %v665_v10 }
 0x18d   :  { %v873_v17 = vmul.f32 %v1204_v11, %v857_v9  ;;  %v742_v19 = vpop.xlane.xlu0 %741  ;;  %v860_v11 = vsub.f32 %v1494_v15, %v1589_v8 }
 0x18e   :  { %1209 = vrsqrt.f32 %v827_v14  ;;  %v780_v20 = vmul.f32 0.015625, %v742_v19  ;;  %v797_v24 = vmul.f32 %v1599_v18, %v1599_v18 }
 0x18f   :  { %v896_v21 = vmul.f32 %v1595_v12, %v873_v17  ;;  %v745_v22 = vpop.xlane.xlu1 %744 }
 0x190   :  { %v812_v26 = vsub.f32 %v780_v20, %v796_v16  ;;  %v781_v27 = vmul.f32 0.015625, %v745_v22  ;;  %v861_v20 = vsub.f32 %v1492_v13, %v1599_v18 }
 0x191   :  { %v919_v28 = vadd.f32 %v1604_v59, %v896_v21  ;;  %v668_v30 = vpop.xlane.xlu0 %667 }
 0x192   :  { %v1206_v31 = vpop.eup %1205  ;;  %v828_v32 = vadd.f32 1e-05, %v812_v26  ;;  %v813_v34 = vsub.f32 %v781_v27, %v797_v24  ;;  %v1611_v36 = vmul.f32 0.015625, %v668_v30 }
 0x193   :  { %935 = vst.msk [vmem:[#allocation4 + $0x8] sm:$0xff] %vm261_vm0, %v919_v28  ;;  %v872_v37 = vmul.f32 %v1206_v31, %v856_v29  ;;  %v671_v38 = vpop.xlane.xlu1 %670 }
 0x194   :  { %1211 = vrsqrt.f32 %v828_v32  ;;  %v829_v39 = vadd.f32 1e-05, %v813_v34  ;;  %v798_v40 = vmul.f32 %v1611_v36, %v1611_v36  ;;  %v1618_v61 = vmul.f32 0.015625, %v671_v38 }
 0x195   :  { %v895_v43 = vmul.f32 %v1595_v12, %v872_v37  ;;  %v748_v41 = vpop.xlane.xlu0 %747 }
 0x196   :  { %v1208_v46 = vpop.eup %1207  ;;  %1213 = vrsqrt.f32 %v829_v39  ;;  %v782_v47 = vmul.f32 0.015625, %v748_v41  ;;  %v799_v57 = vmul.f32 %v1618_v61, %v1618_v61 }
 0x197   :  { %v918_v49 = vadd.f32 %v1604_v59, %v895_v43  ;;  %v874_v52 = vmul.f32 %v1208_v46, %v858_v45  ;;  %v751_v55 = vpop.xlane.xlu1 %750 }
 0x198   :  { %v1210_v56 = vpop.eup %1209  ;;  %v814_v58 = vsub.f32 %v782_v47, %v798_v40  ;;  %v783_v60 = vmul.f32 0.015625, %v751_v55  ;;  %v862_v40 = vsub.f32 %v1505_v25, %v1611_v36  ;;  %v863_v47 = vsub.f32 %v1503_v23, %v1618_v61 }
 0x199   :  { %934 = vst.msk [vmem:[#allocation4] sm:$0xff] %vm261_vm0, %v918_v49  ;;  %v897_v6 = vmul.f32 %v1595_v12, %v874_v52  ;;  %v875_v54 = vmul.f32 %v1210_v56, %v859_v48  ;;  %v674_v63 = vpop.xlane.xlu0 %673 }
 0x19a   :  { %v830_v1 = vadd.f32 1e-05, %v814_v58  ;;  %v815_v2 = vsub.f32 %v783_v60, %v799_v57  ;;  %v1627_v4 = vmul.f32 0.015625, %v674_v63 }
 0x19b   :  { %v920_v3 = vadd.f32 %v1604_v59, %v897_v6  ;;  %v898_v50 = vmul.f32 %v1595_v12, %v875_v54  ;;  %v677_v5 = vpop.xlane.xlu1 %676 }
 0x19c   :  { %1215 = vrsqrt.f32 %v830_v1  ;;  %v831_v7 = vadd.f32 1e-05, %v815_v2  ;;  %v800_v9 = vmul.f32 %v1627_v4, %v1627_v4  ;;  %v1637_v14 = vmul.f32 0.015625, %v677_v5 }
 0x19d   :  { %936 = vst.msk [vmem:[#allocation4 + $0x10] sm:$0xff] %vm261_vm0, %v920_v3  ;;  %v921_v10 = vadd.f32 %v1604_v59, %v898_v50  ;;  %v754_v16 = vpop.xlane.xlu0 %753  ;;  %v864_v50 = vsub.f32 %v1515_v35, %v1627_v4 }
 0x19e   :  { %v1212_v17 = vpop.eup %1211  ;;  %1217 = vrsqrt.f32 %v831_v7  ;;  %v784_v19 = vmul.f32 0.015625, %v754_v16  ;;  %v801_v26 = vmul.f32 %v1637_v14, %v1637_v14 }
 0x19f   :  { %937 = vst.msk [vmem:[#allocation4 + $0x18] sm:$0xff] %vm261_vm0, %v921_v10  ;;  %v876_v21 = vmul.f32 %v1212_v17, %v860_v11  ;;  %v757_v22 = vpop.xlane.xlu1 %756  ;;  %v865_v11 = vsub.f32 %v1513_v33, %v1637_v14 }
 0x1a0   :  { %v1214_v24 = vpop.eup %1213  ;;  %v816_v27 = vsub.f32 %v784_v19, %v800_v9  ;;  %v785_v28 = vmul.f32 0.015625, %v757_v22 }
 0x1a1   :  { %v899_v15 = vmul.f32 %v1595_v12, %v876_v21  ;;  %v877_v8 = vmul.f32 %v1214_v24, %v861_v20  ;;  %v680_v29 = vpop.xlane.xlu0 %679 }
 0x1a2   :  { %v832_v30 = vadd.f32 1e-05, %v816_v27  ;;  %v817_v31 = vsub.f32 %v785_v28, %v801_v26  ;;  %v1645_v32 = vmul.f32 0.015625, %v680_v29 }
 0x1a3   :  { %v922_v34 = vadd.f32 %v1604_v59, %v899_v15  ;;  %v900_v13 = vmul.f32 %v1595_v12, %v877_v8  ;;  %v683_v18 = vpop.xlane.xlu1 %682 }
 0x1a4   :  { %1219 = vrsqrt.f32 %v832_v30  ;;  %v833_v37 = vadd.f32 1e-05, %v817_v31  ;;  %v802_v38 = vmul.f32 %v1645_v32, %v1645_v32  ;;  %v1655_v43 = vmul.f32 0.015625, %v683_v18 }
 0x1a5   :  { %938 = vst.msk [vmem:[#allocation4 + $0x20] sm:$0xff] %vm261_vm0, %v922_v34  ;;  %v923_v39 = vadd.f32 %v1604_v59, %v900_v13  ;;  %v760_v45 = vpop.xlane.xlu0 %759  ;;  %v866_v31 = vsub.f32 %v1524_v44, %v1645_v32 }
 0x1a6   :  { %v1216_v41 = vpop.eup %1215  ;;  %1221 = vrsqrt.f32 %v833_v37  ;;  %v786_v46 = vmul.f32 0.015625, %v760_v45  ;;  %v803_v55 = vmul.f32 %v1655_v43, %v1655_v43 }
 0x1a7   :  { %939 = vst.msk [vmem:[#allocation4 + $0x28] sm:$0xff] %vm261_vm0, %v923_v39  ;;  %v878_v48 = vmul.f32 %v1216_v41, %v862_v40  ;;  %v763_v49 = vpop.xlane.xlu1 %762 }
 0x1a8   :  { %v1218_v52 = vpop.eup %1217  ;;  %v818_v56 = vsub.f32 %v786_v46, %v802_v38  ;;  %v787_v57 = vmul.f32 0.015625, %v763_v49  ;;  %v867_v38 = vsub.f32 %v1522_v42, %v1655_v43 }
 0x1a9   :  { %v901_v25 = vmul.f32 %v1595_v12, %v878_v48  ;;  %v879_v36 = vmul.f32 %v1218_v52, %v863_v47  ;;  %v686_v58 = vpop.xlane.xlu0 %685 }
 0x1aa   :  { %v834_v60 = vadd.f32 1e-05, %v818_v56  ;;  %v819_v6 = vsub.f32 %v787_v57, %v803_v55  ;;  %v1663_v54 = vmul.f32 0.015625, %v686_v58 }
 0x1ab   :  { %v924_v63 = vadd.f32 %v1604_v59, %v901_v25  ;;  %v902_v23 = vmul.f32 %v1595_v12, %v879_v36  ;;  %v689_v61 = vpop.xlane.xlu1 %688 }
 0x1ac   :  { %1223 = vrsqrt.f32 %v834_v60  ;;  %v835_v1 = vadd.f32 1e-05, %v819_v6  ;;  %v804_v2 = vmul.f32 %v1663_v54, %v1663_v54  ;;  %v709_v5 = vmul.f32 0.015625, %v689_v61 }
 0x1ad   :  { %940 = vst.msk [vmem:[#allocation4 + $0x30] sm:$0xff] %vm261_vm0, %v924_v63  ;;  %v925_v3 = vadd.f32 %v1604_v59, %v902_v23  ;;  %v766_v7 = vpop.xlane.xlu0 %765  ;;  %v868_v43 = vsub.f32 %v1533_v53, %v1663_v54 }
 0x1ae   :  { %v1220_v9 = vpop.eup %1219  ;;  %1225 = vrsqrt.f32 %v835_v1  ;;  %v788_v10 = vmul.f32 0.015625, %v766_v7  ;;  %v805_v20 = vmul.f32 %v709_v5, %v709_v5  ;;  %v869_v25 = vsub.f32 %v1531_v51, %v709_v5 }
 0x1af   :  { %941 = vst.msk [vmem:[#allocation4 + $0x38] sm:$0xff] %vm261_vm0, %v925_v3  ;;  %v880_v16 = vmul.f32 %v1220_v9, %v864_v50  ;;  %v769_v17 = vpop.xlane.xlu1 %768 }
 0x1b0   :  { %v1222_v19 = vpop.eup %1221  ;;  %v820_v21 = vsub.f32 %v788_v10, %v804_v2  ;;  %v789_v22 = vmul.f32 0.015625, %v769_v17 }
 0x1b1   :  { %v903_v24 = vmul.f32 %v1595_v12, %v880_v16  ;;  %v881_v26 = vmul.f32 %v1222_v19, %v865_v11  ;;  %v692_v35 = vpop.xlane.xlu0 %691 }
 0x1b2   :  { %v836_v4 = vadd.f32 1e-05, %v820_v21  ;;  %v821_v27 = vsub.f32 %v789_v22, %v805_v20  ;;  %v710_v28 = vmul.f32 0.015625, %v692_v35 }
 0x1b3   :  { %v926_v15 = vadd.f32 %v1604_v59, %v903_v24  ;;  %v904_v8 = vmul.f32 %v1595_v12, %v881_v26  ;;  %v695_v29 = vpop.xlane.xlu1 %694 }
 0x1b4   :  { %1227 = vrsqrt.f32 %v836_v4  ;;  %v837_v33 = vadd.f32 1e-05, %v821_v27  ;;  %v806_v14 = vmul.f32 %v710_v28, %v710_v28  ;;  %v711_v34 = vmul.f32 0.015625, %v695_v29 }
 0x1b5   :  { %942 = vst.msk [vmem:[#allocation4 + $0x40] sm:$0xff] %vm261_vm0, %v926_v15  ;;  %v927_v30 = vadd.f32 %v1604_v59, %v904_v8  ;;  %v772_v13 = vpop.xlane.xlu0 %771  ;;  %v870_v53 = vsub.f32 %v1542_v0, %v710_v28 }
 0x1b6   :  { %v1224_v18 = vpop.eup %1223  ;;  %1229 = vrsqrt.f32 %v837_v33  ;;  %v790_v37 = vmul.f32 0.015625, %v772_v13  ;;  %v807_v41 = vmul.f32 %v711_v34, %v711_v34  ;;  %v871_v51 = vsub.f32 %v1540_v62, %v711_v34 }
 0x1b7   :  { %943 = vst.msk [vmem:[#allocation4 + $0x48] sm:$0xff] %vm261_vm0, %v927_v30  ;;  %v882_v39 = vmul.f32 %v1224_v18, %v866_v31  ;;  %v775_v40 = vpop.xlane.xlu1 %774 }
 0x1b8   :  { %v1226_v45 = vpop.eup %1225  ;;  %v822_v46 = vsub.f32 %v790_v37, %v806_v14  ;;  %v791_v47 = vmul.f32 0.015625, %v775_v40 }
 0x1b9   :  { %v905_v48 = vmul.f32 %v1595_v12, %v882_v39  ;;  %v883_v49 = vmul.f32 %v1226_v45, %v867_v38 }
 0x1ba   :  { %v838_v44 = vadd.f32 1e-05, %v822_v46  ;;  %v823_v32 = vsub.f32 %v791_v47, %v807_v41 }
 0x1bb   :  { %v928_v52 = vadd.f32 %v1604_v59, %v905_v48  ;;  %v906_v55 = vmul.f32 %v1595_v12, %v883_v49 }
 0x1bc   :  { %1231 = vrsqrt.f32 %v838_v44  ;;  %v839_v56 = vadd.f32 1e-05, %v823_v32 }
 0x1bd   :  { %944 = vst.msk [vmem:[#allocation4 + $0x50] sm:$0xff] %vm261_vm0, %v928_v52  ;;  %v929_v42 = vadd.f32 %v1604_v59, %v906_v55 }
 0x1be   :  { %v1228_v57 = vpop.eup %1227  ;;  %1233 = vrsqrt.f32 %v839_v56 }
 0x1bf   :  { %945 = vst.msk [vmem:[#allocation4 + $0x58] sm:$0xff] %vm261_vm0, %v929_v42  ;;  %v884_v36 = vmul.f32 %v1228_v57, %v868_v43 }
 0x1c0   :  { %v1230_v58 = vpop.eup %1229 }
 0x1c1   :  { %v907_v60 = vmul.f32 %v1595_v12, %v884_v36  ;;  %v885_v6 = vmul.f32 %v1230_v58, %v869_v25 }
 0x1c3   :  { %v930_v63 = vadd.f32 %v1604_v59, %v907_v60  ;;  %v908_v23 = vmul.f32 %v1595_v12, %v885_v6 }
 0x1c5   :  { %946 = vst.msk [vmem:[#allocation4 + $0x60] sm:$0xff] %vm261_vm0, %v930_v63  ;;  %v931_v61 = vadd.f32 %v1604_v59, %v908_v23 }
 0x1c6   :  { %v1232_v54 = vpop.eup %1231 }
 0x1c7   :  { %947 = vst.msk [vmem:[#allocation4 + $0x68] sm:$0xff] %vm261_vm0, %v931_v61  ;;  %v886_v1 = vmul.f32 %v1232_v54, %v870_v53 }
 0x1c8   :  { %v1234_v2 = vpop.eup %1233 }
 0x1c9   :  { %v909_v3 = vmul.f32 %v1595_v12, %v886_v1  ;;  %v887_v50 = vmul.f32 %v1234_v2, %v871_v51 }
 0x1cb   :  { %v932_v5 = vadd.f32 %v1604_v59, %v909_v3  ;;  %v910_v7 = vmul.f32 %v1595_v12, %v887_v50 }
 0x1cd   :  { %948 = vst.msk [vmem:[#allocation4 + $0x70] sm:$0xff] %vm261_vm0, %v932_v5  ;;  %v933_v0 = vadd.f32 %v1604_v59, %v910_v7 }
 0x1cf   :  { %949 = vst.msk [vmem:[#allocation4 + $0x78] sm:$0xff] %vm261_vm0, %v933_v0 }
 0x1d0   :  { %1246 = shalt.err (!%p1243_p4)
}
 0x1d1   :  { %s1247_s20 = scalar_lea.hbm %s1727_s6, 2048 }
 0x1d2   :  { %p1248_p5 = scmp.ne.s32.totalorder %s1727_s6, %s1247_s20  ;;  %p1251_p6 = scmp.lt.u32.totalorder %s1247_s20, %s1727_s6 }
 0x1d4   :  { %p1253_p7 = pnand %p1251_p6, %p1248_p5 }
 0x1d6   :  { %1256 = shalt.err (!%p1253_p7)
}
 0x1d7   :  { %s1260_s25 = smov 128   ;;  %s1261_s26 = smov 8  }
 0x1d8   :  { %961 = dma.vmem_to_hbm [thread:$0]  %s956_s5, 2048, %s1727_s6, [#allocation5], %s1260_s25, %s1260_s25, %s1261_s26  }
 0x1d9   :  { %1257 = dma.done.wait [#allocation5], 2048  }
 0x1da   :  { %1258 = vsyncadd [#allocation5], 4294965248 }
 0x1db   :  { %965 = vsyncpa [#allocation5], 1 }

</bundles_post_ra>
